<compile_context>
chip_gen: v7x
topology: tpu7x:2x2x1
jax: 0.10.0
libtpu: 0.0.40
codegen_flags: <defaults>
</compile_context>

<pallas_src>
import math
import jax
import jax.numpy as jnp
from jax.experimental import pallas as pl
from jax.experimental.pallas import tpu as pltpu


def _round_up(x, m):
    return ((x + m - 1) // m) * m


def lstmp_cell_kernel(xh_ref, c_ref, w_ref, wrec_ref, b_ref, h_out_ref, c_out_ref):
    H = c_ref.shape[1]

    # Single fused gate GEMM on the MXU: bf16 operands, f32 accumulation.
    pre = jnp.dot(xh_ref[...], w_ref[...],
                  preferred_element_type=jnp.float32) + b_ref[...]

    # Gate math in f32 on the VPU/EUP (gate slices are lane-aligned when H % 128 == 0).
    i = jax.nn.sigmoid(pre[:, 0 * H:1 * H])
    f = jax.nn.sigmoid(pre[:, 1 * H:2 * H])
    g = jnp.tanh(pre[:, 2 * H:3 * H])
    o = jax.nn.sigmoid(pre[:, 3 * H:4 * H])

    c_new = f * c_ref[...].astype(jnp.float32) + i * g
    h_act = o * jnp.tanh(c_new)

    # Recurrent projection: second MXU matmul (bf16 operands, f32 accumulation).
    h_proj = jnp.dot(h_act.astype(wrec_ref.dtype), wrec_ref[...],
                     preferred_element_type=jnp.float32)

    c_out_ref[...] = c_new.astype(c_out_ref.dtype)
    h_out_ref[...] = h_proj.astype(h_out_ref.dtype)


def prepare_lstmp_params(weight_ih, weight_hh, weight_rec, bias=None,
                         compute_dtype=jnp.bfloat16):
    """One-time weight prep (transpose + concat + pad + bf16 cast), hoisted out of the step path."""
    four_h, input_size = weight_ih.shape
    hidden_size = four_h // 4
    recurrent_size = weight_hh.shape[1]
    assert weight_hh.shape == (four_h, recurrent_size)
    assert weight_rec.shape == (recurrent_size, hidden_size)

    k_in = _round_up(input_size, 128)  # lane-align the x-part of [x | h]
    wih_t = jnp.zeros((k_in, four_h), weight_ih.dtype).at[:input_size, :].set(weight_ih.T)
    w_cat = jnp.concatenate([wih_t, weight_hh.T], axis=0).astype(compute_dtype)  # (k_in + R, 4H)
    wrec_t = weight_rec.T.astype(compute_dtype)                                  # (H, R)

    if bias is None:
        bias = jnp.zeros((four_h,), jnp.float32)
    b2d = bias.astype(jnp.float32).reshape(1, four_h)

    return {
        "w_cat": w_cat, "wrec_t": wrec_t, "bias": b2d,
        "input_size": input_size, "k_in": k_in,
        "hidden_size": hidden_size, "recurrent_size": recurrent_size,
        "compute_dtype": compute_dtype,
    }


def lstmp_cell(x, h, c, params, *, block_b=None):
    """Pallas LSTMPCell forward. Returns (h_new, c_new) with shapes (B, R), (B, H)."""
    B = x.shape[0]
    H = params["hidden_size"]
    R = params["recurrent_size"]
    k_in = params["k_in"]
    in_sz = params["input_size"]
    cd = params["compute_dtype"]
    w_cat, wrec_t, b2d = params["w_cat"], params["wrec_t"], params["bias"]
    K = k_in + R

    assert x.shape == (B, in_sz) and h.shape == (B, R) and c.shape == (B, H)

    # Build the fused, lane-aligned activation slab [x | 0-pad | h] in the MXU compute dtype.
    parts = [x.astype(cd)]
    if k_in != in_sz:
        parts.append(jnp.zeros((B, k_in - in_sz), cd))
    parts.append(h.astype(cd))
    xh = jnp.concatenate(parts, axis=1)  # (B, K)

    tb = B if block_b is None else block_b
    assert B % tb == 0
    grid = (B // tb,)

    nbytes = lambda a: a.size * a.dtype.itemsize
    cost = pl.CostEstimate(
        flops=2 * B * K * 4 * H + 2 * B * H * R,
        transcendentals=5 * B * H,  # 3 sigmoids + 2 tanh per hidden unit
        bytes_accessed=(nbytes(xh) + nbytes(c) + nbytes(w_cat) + nbytes(wrec_t)
                        + nbytes(b2d) + B * R * x.dtype.itemsize
                        + B * H * c.dtype.itemsize),
    )

    h_new, c_new = pl.pallas_call(
        lstmp_cell_kernel,
        out_shape=(jax.ShapeDtypeStruct((B, R), x.dtype),
                   jax.ShapeDtypeStruct((B, H), c.dtype)),
        grid=grid,
        in_specs=[
            pl.BlockSpec((tb, K), lambda b: (b, 0)),       # [x | h] (batch-blocked)
            pl.BlockSpec((tb, H), lambda b: (b, 0)),       # c (batch-blocked)
            pl.BlockSpec((K, 4 * H), lambda b: (0, 0)),    # fused gate weights (VMEM-resident)
            pl.BlockSpec((H, R), lambda b: (0, 0)),        # projection weights (VMEM-resident)
            pl.BlockSpec((1, 4 * H), lambda b: (0, 0)),    # bias
        ],
        out_specs=(pl.BlockSpec((tb, R), lambda b: (b, 0)),
                   pl.BlockSpec((tb, H), lambda b: (b, 0))),
        input_output_aliases={1: 1},                       # c -> c_out (in-place recurrent state)
        compiler_params=pltpu.CompilerParams(
            dimension_semantics=("parallel",)),            # batch axis splits across v7x TCs
        cost_estimate=cost,
    )(xh, c, w_cat, wrec_t, b2d)
    return h_new, c_new


def lstmp_cell_ref(x, h, c, weight_ih, weight_hh, weight_rec, bias):
    """Pure-JAX f32 reference matching the PyTorch LSTMPCell forward."""
    H = weight_ih.shape[0] // 4
    pre = x @ weight_ih.T + bias + h @ weight_hh.T
    i = jax.nn.sigmoid(pre[:, :H])
    f = jax.nn.sigmoid(pre[:, H:2 * H])
    g = jnp.tanh(pre[:, 2 * H:3 * H])
    o = jax.nn.sigmoid(pre[:, 3 * H:])
    c_new = f * c + i * g
    h_new = (o * jnp.tanh(c_new)) @ weight_rec.T
    return h_new, c_new


if __name__ == "__main__":
    B = 8
    input_size = 64
    hidden_size = 128      # multiple of 128 -> gate slices are lane-aligned
    recurrent_size = 128   # projection output size

    key = jax.random.PRNGKey(0)
    ks = jax.random.split(key, 7)

    # reset_parameters(): uniform(-stdv, stdv), stdv = 1/sqrt(hidden_size)
    stdv = 1.0 / math.sqrt(hidden_size)
    weight_ih = jax.random.uniform(ks[0], (4 * hidden_size, input_size),
                                   jnp.float32, -stdv, stdv)
    weight_hh = jax.random.uniform(ks[1], (4 * hidden_size, recurrent_size),
                                   jnp.float32, -stdv, stdv)
    weight_rec = jax.random.uniform(ks[2], (recurrent_size, hidden_size),
                                    jnp.float32, -stdv, stdv)
    bias = jax.random.uniform(ks[3], (4 * hidden_size,), jnp.float32, -stdv, stdv)

    x = jax.random.normal(ks[4], (B, input_size), jnp.float32)
    h0 = jax.random.normal(ks[5], (B, recurrent_size), jnp.float32)
    c0 = jax.random.normal(ks[6], (B, hidden_size), jnp.float32)

    # f32 reference (computed before the kernel call, which aliases the c buffer).
    h_ref, c_ref = lstmp_cell_ref(x, h0, c0, weight_ih, weight_hh, weight_rec, bias)

    params = prepare_lstmp_params(weight_ih, weight_hh, weight_rec, bias)
    h1, c1 = lstmp_cell(x, h0, c0, params)
    jax.block_until_ready((h1, c1))

    assert h1.shape == (B, recurrent_size) and c1.shape == (B, hidden_size)
    # bf16 MXU operands (f32 accumulation) -> loosened tolerance vs the f32 reference.
    assert jnp.allclose(c1, c_ref, atol=2e-2, rtol=2e-2), float(jnp.max(jnp.abs(c1 - c_ref)))
    assert jnp.allclose(h1, h_ref, atol=2e-2, rtol=2e-2), float(jnp.max(jnp.abs(h1 - h_ref)))

    print("KERNEL_OK")
</pallas_src>

<mosaic_0001>
module attributes {stable_mosaic.version = 11 : i64} {
  func.func @lstmp_cell_kernel(%arg0: i32, %arg1: memref<8x256xbf16, #tpu.memory_space<vmem>>, %arg2: memref<8x128xf32, #tpu.memory_space<vmem>>, %arg3: memref<256x512xbf16, #tpu.memory_space<vmem>>, %arg4: memref<128x128xbf16, #tpu.memory_space<vmem>>, %arg5: memref<1x512xf32, #tpu.memory_space<vmem>>, %arg6: memref<8x128xf32, #tpu.memory_space<vmem>>, %arg7: memref<8x128xf32, #tpu.memory_space<vmem>>) attributes {dimension_semantics = [#tpu.dimension_semantics<parallel>], iteration_bounds = array<i64: 1>, scalar_prefetch = 0 : i64, scratch_operands = 0 : i64, tpu.core_type = #tpu.core_type<tc>, window_params = [{transform_indices = @transform_0, window_bounds = array<i64: 8, 256>}, {transform_indices = @transform_1, window_bounds = array<i64: 8, 128>}, {pipeline_mode = #tpu.pipeline_mode<synchronous>, transform_indices = @transform_2, window_bounds = array<i64: 256, 512>}, {pipeline_mode = #tpu.pipeline_mode<synchronous>, transform_indices = @transform_3, window_bounds = array<i64: 128, 128>}, {pipeline_mode = #tpu.pipeline_mode<synchronous>, transform_indices = @transform_4, window_bounds = array<i64: 1, 512>}, {transform_indices = @transform_5, window_bounds = array<i64: 8, 128>}, {transform_indices = @transform_6, window_bounds = array<i64: 8, 128>}]} {
    %c0 = arith.constant 0 : index
    %c0_0 = arith.constant 0 : index
    %0 = vector.load %arg1[%c0, %c0_0] : memref<8x256xbf16, #tpu.memory_space<vmem>>, vector<8x256xbf16>
    %c0_1 = arith.constant 0 : index
    %c0_2 = arith.constant 0 : index
    %1 = vector.load %arg3[%c0_1, %c0_2] : memref<256x512xbf16, #tpu.memory_space<vmem>>, vector<256x512xbf16>
    %cst = arith.constant dense<0.000000e+00> : vector<8x512xf32>
    %2 = tpu.matmul %0, %1, %cst {dimension_numbers = #tpu.dot_dimension_numbers<[1], [0], [0], [1], [0, 0, 1, 1], [], []>} : vector<8x256xbf16>, vector<256x512xbf16>, vector<8x512xf32> -> vector<8x512xf32>
    %c0_3 = arith.constant 0 : index
    %c0_4 = arith.constant 0 : index
    %3 = vector.load %arg5[%c0_3, %c0_4] : memref<1x512xf32, #tpu.memory_space<vmem>>, vector<1x512xf32>
    %4 = vector.broadcast %3 : vector<1x512xf32> to vector<8x512xf32>
    %5 = arith.addf %2, %4 : vector<8x512xf32>
    %6 = vector.extract_strided_slice %5 {offsets = [0, 0], sizes = [8, 128], strides = [1, 1]} : vector<8x512xf32> to vector<8x128xf32>
    %7 = arith.negf %6 : vector<8x128xf32>
    %8 = math.exp %7 : vector<8x128xf32>
    %cst_5 = arith.constant 1.000000e+00 : f32
    %9 = vector.broadcast %cst_5 : f32 to vector<8x128xf32>
    %10 = arith.addf %9, %8 : vector<8x128xf32>
    %11 = arith.divf %9, %10 : vector<8x128xf32>
    %12 = vector.extract_strided_slice %5 {offsets = [0, 128], sizes = [8, 128], strides = [1, 1]} : vector<8x512xf32> to vector<8x128xf32>
    %13 = arith.negf %12 : vector<8x128xf32>
    %14 = math.exp %13 : vector<8x128xf32>
    %cst_6 = arith.constant 1.000000e+00 : f32
    %15 = vector.broadcast %cst_6 : f32 to vector<8x128xf32>
    %16 = arith.addf %15, %14 : vector<8x128xf32>
    %17 = arith.divf %15, %16 : vector<8x128xf32>
    %18 = vector.extract_strided_slice %5 {offsets = [0, 256], sizes = [8, 128], strides = [1, 1]} : vector<8x512xf32> to vector<8x128xf32>
    %19 = math.tanh %18 : vector<8x128xf32>
    %20 = vector.extract_strided_slice %5 {offsets = [0, 384], sizes = [8, 128], strides = [1, 1]} : vector<8x512xf32> to vector<8x128xf32>
    %21 = arith.negf %20 : vector<8x128xf32>
    %22 = math.exp %21 : vector<8x128xf32>
    %cst_7 = arith.constant 1.000000e+00 : f32
    %23 = vector.broadcast %cst_7 : f32 to vector<8x128xf32>
    %24 = arith.addf %23, %22 : vector<8x128xf32>
    %25 = arith.divf %23, %24 : vector<8x128xf32>
    %c0_8 = arith.constant 0 : index
    %c0_9 = arith.constant 0 : index
    %26 = vector.load %arg2[%c0_8, %c0_9] : memref<8x128xf32, #tpu.memory_space<vmem>>, vector<8x128xf32>
    %27 = arith.mulf %17, %26 : vector<8x128xf32>
    %28 = arith.mulf %11, %19 : vector<8x128xf32>
    %29 = arith.addf %27, %28 : vector<8x128xf32>
    %30 = math.tanh %29 : vector<8x128xf32>
    %31 = arith.mulf %25, %30 : vector<8x128xf32>
    %32 = arith.truncf %31 : vector<8x128xf32> to vector<8x128xbf16>
    %c0_10 = arith.constant 0 : index
    %c0_11 = arith.constant 0 : index
    %33 = vector.load %arg4[%c0_10, %c0_11] : memref<128x128xbf16, #tpu.memory_space<vmem>>, vector<128x128xbf16>
    %cst_12 = arith.constant dense<0.000000e+00> : vector<8x128xf32>
    %34 = tpu.matmul %32, %33, %cst_12 {dimension_numbers = #tpu.dot_dimension_numbers<[1], [0], [0], [1], [0, 0, 1, 1], [], []>} : vector<8x128xbf16>, vector<128x128xbf16>, vector<8x128xf32> -> vector<8x128xf32>
    %c0_13 = arith.constant 0 : index
    %c0_14 = arith.constant 0 : index
    %35 = vector.load %arg7[%c0_13, %c0_14] : memref<8x128xf32, #tpu.memory_space<vmem>>, vector<8x128xf32>
    tpu.vector_store %arg7[%c0_13, %c0_14], %29 {strides = array<i32>} : memref<8x128xf32, #tpu.memory_space<vmem>>, vector<8x128xf32>,
    %c0_15 = arith.constant 0 : index
    %c0_16 = arith.constant 0 : index
    %36 = vector.load %arg6[%c0_15, %c0_16] : memref<8x128xf32, #tpu.memory_space<vmem>>, vector<8x128xf32>
    tpu.vector_store %arg6[%c0_15, %c0_16], %34 {strides = array<i32>} : memref<8x128xf32, #tpu.memory_space<vmem>>, vector<8x128xf32>,
    return
  }
  func.func @transform_0(%arg0: i32) -> (i32, i32) {
    %c0_i32 = arith.constant 0 : i32
    %c0_i32_0 = arith.constant 0 : i32
    return %arg0, %c0_i32 : i32, i32
  }
  func.func @transform_1(%arg0: i32) -> (i32, i32) {
    %c0_i32 = arith.constant 0 : i32
    %c0_i32_0 = arith.constant 0 : i32
    return %arg0, %c0_i32 : i32, i32
  }
  func.func @transform_2(%arg0: i32) -> (i32, i32) {
    %c0_i32 = arith.constant 0 : i32
    %c0_i32_0 = arith.constant 0 : i32
    %c0_i32_1 = arith.constant 0 : i32
    return %c0_i32, %c0_i32_0 : i32, i32
  }
  func.func @transform_3(%arg0: i32) -> (i32, i32) {
    %c0_i32 = arith.constant 0 : i32
    %c0_i32_0 = arith.constant 0 : i32
    %c0_i32_1 = arith.constant 0 : i32
    return %c0_i32, %c0_i32_0 : i32, i32
  }
  func.func @transform_4(%arg0: i32) -> (i32, i32) {
    %c0_i32 = arith.constant 0 : i32
    %c0_i32_0 = arith.constant 0 : i32
    %c0_i32_1 = arith.constant 0 : i32
    return %c0_i32, %c0_i32_0 : i32, i32
  }
  func.func @transform_5(%arg0: i32) -> (i32, i32) {
    %c0_i32 = arith.constant 0 : i32
    %c0_i32_0 = arith.constant 0 : i32
    return %arg0, %c0_i32 : i32, i32
  }
  func.func @transform_6(%arg0: i32) -> (i32, i32) {
    %c0_i32 = arith.constant 0 : i32
    %c0_i32_0 = arith.constant 0 : i32
    return %arg0, %c0_i32 : i32, i32
  }
}

</mosaic_0001>

<bundles_post_ra>
// kernel: tpu_custom_call.1
= control target key start
LH: loop header
LB: loop body
LE: loop exit
PB: predicated region body
PF: predicated region fallthrough
CT: control target
= control target key end

     0   :  { %12 = vsyncpa [#allocation3], 0  ;;  %s1191_s0 = inlined_call_operand.vmem [shape: bf16[8,256], index: 0, kind: input, shape index: {}]   ;;  %s1192_s1 = inlined_call_operand.hbm [shape: f32[8,128], index: 1, kind: input, shape index: {}, may-alias: {1,6}]   ;;  %s1193_s2 = inlined_call_operand.hbm [shape: bf16[256,512], index: 2, kind: input, shape index: {}]   ;;  %s1194_s3 = inlined_call_operand.hbm [shape: bf16[128,128], index: 3, kind: input, shape index: {}]   ;;  %s1195_s4 = inlined_call_operand.vmem [shape: f32[1,512], index: 4, kind: input, shape index: {}]   ;;  %s1196_s5 = inlined_call_operand.hbm [shape: f32[8,128], index: 5, kind: output, shape index: {0}]   ;;  %s1197_s6 = inlined_call_operand.hbm [shape: f32[8,128], index: 6, kind: output, shape index: {1}, may-alias: {1,6}]  }
   0x1   :  { %13 = vsyncpa [#allocation6], 0 }
   0x2   :  { %14 = vsyncpa [#allocation4], 0 }
   0x3   :  { %15 = vsyncpa [#allocation10], 0  ;;  %s1079_s21 = smov [#allocation5]   ;;  %s961_s25 = scalar_lea.hbm %s1193_s2, 8192 }
   0x4   :  { %s33_s22 = sshll.u32 %s1079_s21, 4  ;;  %p962_p0 = scmp.ne.s32.totalorder %s1193_s2, %s961_s25  ;;  %s34_s22 = int_to_ptr.vmem [resolvable:$true] %s33_s22 }
   0x5   :  { %p965_p1 = scmp.lt.u32.totalorder %s961_s25, %s1193_s2 }
   0x7   :  { %p967_p2 = pnand %p965_p1, %p962_p0 }
   0x9   :  { %970 = shalt.err (!%p967_p2)
}
   0xa   :  { %s971_s30 = scalar_lea.vmem %s34_s22, 8192  ;;  %p976_p4 = scmp.lt.s32.totalorder %s34_s22, %s34_s22 }
   0xb   :  { %p972_p3 = scmp.ne.s32.totalorder %s34_s22, %s971_s30  ;;  %p977_p5 = scmp.lt.s32.totalorder %s971_s30, %s971_s30 }
   0xd   :  { %p978_p6 = por %p977_p5, %p976_p4 }
   0xf   :  { %p979_p7 = pnand %p978_p6, %p972_p3 }
  0x11   :  { %982 = shalt.err (!%p979_p7)
}
  0x12   :  { %s1080_s7 = smov 256   ;;  %s1081_s8 = smov 16  }
  0x13   :  { %39 = dma.hbm_to_vmem [thread:$0]  %s1193_s2, 8192, %s34_s22, [#allocation6], %s1080_s7, %s1080_s7, %s1081_s8  }
  0x14   :  { %s1082_s11 = smov [#allocation2]   ;;  %s1083_s13 = smov [#allocation7]  }
  0x15   :  { %s24_s12 = sshll.u32 %s1082_s11, 4  ;;  %s45_s14 = sshll.u32 %s1083_s13, 4  ;;  %s25_s12 = int_to_ptr.vmem [resolvable:$true] %s24_s12  ;;  %s46_s14 = int_to_ptr.vmem [resolvable:$true] %s45_s14 }
  0x16   :  { %s983_s17 = scalar_lea.hbm %s1192_s1, 128 }
  0x17   :  { %p984_p8 = scmp.ne.s32.totalorder %s1192_s1, %s983_s17  ;;  %p987_p9 = scmp.lt.u32.totalorder %s983_s17, %s1192_s1 }
  0x19   :  { %p989_p10 = pnand %p987_p9, %p984_p8 }
  0x1b   :  { %992 = shalt.err (!%p989_p10)
}
  0x1c   :  { %s993_s2 = scalar_lea.vmem %s25_s12, 128  ;;  %p998_p12 = scmp.lt.s32.totalorder %s25_s12, %s25_s12 }
  0x1d   :  { %p994_p11 = scmp.ne.s32.totalorder %s25_s12, %s993_s2  ;;  %p999_p13 = scmp.lt.s32.totalorder %s993_s2, %s993_s2 }
  0x1f   :  { %p1000_p0 = por %p999_p13, %p998_p12 }
  0x21   :  { %p1001_p1 = pnand %p1000_p0, %p994_p11 }
  0x23   :  { %1004 = shalt.err (!%p1001_p1)
}
  0x24   :  { %27 = dma.hbm_to_vmem [thread:$0]  %s1192_s1, 128, %s25_s12, [#allocation3]  }
  0x25   :  { %s1005_s26 = scalar_lea.hbm %s1194_s3, 1024 }
  0x26   :  { %p1006_p2 = scmp.ne.s32.totalorder %s1194_s3, %s1005_s26  ;;  %p1009_p3 = scmp.lt.u32.totalorder %s1005_s26, %s1194_s3 }
  0x28   :  { %p1011_p4 = pnand %p1009_p3, %p1006_p2 }
  0x2a   :  { %1014 = shalt.err (!%p1011_p4)
}
  0x2b   :  { %s1015_s7 = scalar_lea.vmem %s46_s14, 1024  ;;  %p1020_p6 = scmp.lt.s32.totalorder %s46_s14, %s46_s14 }
  0x2c   :  { %p1016_p5 = scmp.ne.s32.totalorder %s46_s14, %s1015_s7  ;;  %p1021_p7 = scmp.lt.s32.totalorder %s1015_s7, %s1015_s7 }
  0x2e   :  { %p1022_p8 = por %p1021_p7, %p1020_p6 }
  0x30   :  { %p1023_p9 = pnand %p1022_p8, %p1016_p5 }
  0x32   :  { %1026 = shalt.err (!%p1023_p9)
}
  0x33   :  { %s1084_s1 = smov 64   ;;  %s1085_s8 = smov 4  }
  0x34   :  { %51 = dma.hbm_to_vmem [thread:$0]  %s1194_s3, 1024, %s46_s14, [#allocation6], %s1084_s1, %s1084_s1, %s1085_s8  }
  0x35   :  { %1071 = dma.done.wait [#allocation3], 128  }
  0x36   :  { %1072 = vsyncadd [#allocation3], 4294967168 }
  0x37   :  { %1073 = dma.done.wait [#allocation6], 9216  }
  0x38   :  { %1074 = vsyncadd [#allocation6], 4294958080  ;;  %v839_v0 = vld [vmem:[#allocation5 + $0x4] ss:$16 sps:$4 sm:$0xff]   ;;  %v841_v1 = vld [vmem:[#allocation5] ss:$16 sps:$4 sm:$0xff]  }
  0x39   :  { %478 = vmatprep.subr.bf16.mxu0 %v839_v0  ;;  %v842_v2 = vld [vmem:[#allocation5 + $0x24] ss:$16 sps:$4 sm:$0xff]   ;;  %v844_v3 = vld [vmem:[#allocation5 + $0x20] ss:$16 sps:$4 sm:$0xff]   ;;  %v850_v5 = vld [vmem:[#allocation5 + $0xc] ss:$16 sps:$4 sm:$0xff]  }
  0x3a   :  { %479 = vmatpush1.bf16.msra.mxu0 %v841_v1  ;;  %v845_v4 = vld [vmem:[#allocation5 + $0x44] ss:$16 sps:$4 sm:$0xff]   ;;  %v853_v6 = vld [vmem:[#allocation5 + $0x8] ss:$16 sps:$4 sm:$0xff]   ;;  %v847_v7 = vld [vmem:[#allocation5 + $0x40] ss:$16 sps:$4 sm:$0xff]   ;;  %519 = vmatprep.subr.bf16.mxu1 %v850_v5 }
  0x3b   :  { %480 = vmatprep.subr.bf16.mxu0 %v842_v2  ;;  %v848_v8 = vld [vmem:[#allocation5 + $0x64] ss:$16 sps:$4 sm:$0xff]   ;;  %520 = vmatpush1.bf16.msra.mxu1 %v853_v6  ;;  %v856_v9 = vld [vmem:[#allocation5 + $0x2c] ss:$16 sps:$4 sm:$0xff]   ;;  %v859_v10 = vld [vmem:[#allocation5 + $0x28] ss:$16 sps:$4 sm:$0xff]  }
  0x3c   :  { %521 = vmatprep.subr.bf16.mxu1 %v856_v9  ;;  %v852_v11 = vld [vmem:[#allocation5 + $0x60] ss:$16 sps:$4 sm:$0xff]   ;;  %v854_v12 = vld [vmem:[#allocation5 + $0x84] ss:$16 sps:$4 sm:$0xff]   ;;  %v862_v13 = vld [vmem:[#allocation5 + $0x4c] ss:$16 sps:$4 sm:$0xff]  }
  0x3d   :  { %v865_v14 = vld [vmem:[#allocation5 + $0x48] ss:$16 sps:$4 sm:$0xff]   ;;  %v868_v15 = vld [vmem:[#allocation5 + $0x6c] ss:$16 sps:$4 sm:$0xff]   ;;  %v858_v16 = vld [vmem:[#allocation5 + $0x80] ss:$16 sps:$4 sm:$0xff]  }
  0x3e   :  { %481 = vmatpush1.bf16.msra.mxu0 %v844_v3  ;;  %v860_v17 = vld [vmem:[#allocation5 + $0xa4] ss:$16 sps:$4 sm:$0xff]   ;;  %v871_v18 = vld [vmem:[#allocation5 + $0x68] ss:$16 sps:$4 sm:$0xff]   ;;  %v874_v19 = vld [vmem:[#allocation5 + $0x8c] ss:$16 sps:$4 sm:$0xff]  }
  0x3f   :  { %482 = vmatprep.subr.bf16.mxu0 %v845_v4  ;;  %522 = vmatpush1.bf16.msra.mxu1 %v859_v10  ;;  %v864_v20 = vld [vmem:[#allocation5 + $0xa0] ss:$16 sps:$4 sm:$0xff]   ;;  %v866_v21 = vld [vmem:[#allocation5 + $0xc4] ss:$16 sps:$4 sm:$0xff]   ;;  %v877_v22 = vld [vmem:[#allocation5 + $0x88] ss:$16 sps:$4 sm:$0xff]  }
  0x40   :  { %523 = vmatprep.subr.bf16.mxu1 %v862_v13  ;;  %v880_v23 = vld [vmem:[#allocation5 + $0xac] ss:$16 sps:$4 sm:$0xff]   ;;  %v870_v24 = vld [vmem:[#allocation5 + $0xc0] ss:$16 sps:$4 sm:$0xff]   ;;  %v872_v25 = vld [vmem:[#allocation5 + $0xe4] ss:$16 sps:$4 sm:$0xff]  }
  0x41   :  { %v883_v26 = vld [vmem:[#allocation5 + $0xa8] ss:$16 sps:$4 sm:$0xff]   ;;  %v886_v27 = vld [vmem:[#allocation5 + $0xcc] ss:$16 sps:$4 sm:$0xff]   ;;  %v876_v28 = vld [vmem:[#allocation5 + $0xe0] ss:$16 sps:$4 sm:$0xff]  }
  0x42   :  { %483 = vmatpush1.bf16.msra.mxu0 %v847_v7  ;;  %v878_v29 = vld [vmem:[#allocation5 + $0x104] ss:$16 sps:$4 sm:$0xff]   ;;  %v889_v30 = vld [vmem:[#allocation5 + $0xc8] ss:$16 sps:$4 sm:$0xff]   ;;  %v892_v31 = vld [vmem:[#allocation5 + $0xec] ss:$16 sps:$4 sm:$0xff]  }
  0x43   :  { %484 = vmatprep.subr.bf16.mxu0 %v848_v8  ;;  %524 = vmatpush1.bf16.msra.mxu1 %v865_v14  ;;  %v882_v32 = vld [vmem:[#allocation5 + $0x100] ss:$16 sps:$4 sm:$0xff]   ;;  %v884_v33 = vld [vmem:[#allocation5 + $0x124] ss:$16 sps:$4 sm:$0xff]   ;;  %v895_v34 = vld [vmem:[#allocation5 + $0xe8] ss:$16 sps:$4 sm:$0xff]  }
  0x44   :  { %525 = vmatprep.subr.bf16.mxu1 %v868_v15  ;;  %v898_v35 = vld [vmem:[#allocation5 + $0x10c] ss:$16 sps:$4 sm:$0xff]   ;;  %v888_v36 = vld [vmem:[#allocation5 + $0x120] ss:$16 sps:$4 sm:$0xff]   ;;  %v890_v37 = vld [vmem:[#allocation5 + $0x144] ss:$16 sps:$4 sm:$0xff]  }
  0x45   :  { %v901_v38 = vld [vmem:[#allocation5 + $0x108] ss:$16 sps:$4 sm:$0xff]   ;;  %v904_v39 = vld [vmem:[#allocation5 + $0x12c] ss:$16 sps:$4 sm:$0xff]   ;;  %v894_v40 = vld [vmem:[#allocation5 + $0x140] ss:$16 sps:$4 sm:$0xff]  }
  0x46   :  { %485 = vmatpush1.bf16.msra.mxu0 %v852_v11  ;;  %v64_v41 = vld [vmem:[%s1191_s0] sm:$0xff]  ;;  %v896_v42 = vld [vmem:[#allocation5 + $0x164] ss:$16 sps:$4 sm:$0xff]   ;;  %v900_v45 = vld [vmem:[#allocation5 + $0x160] ss:$16 sps:$4 sm:$0xff]   ;;  %v1086_v4 = vmov 0.0  }
  0x47   :  { %486 = vmatprep.subr.bf16.mxu0 %v854_v12  ;;  %526 = vmatpush1.bf16.msra.mxu1 %v871_v18  ;;  %v723_v43 = vcombine.high %v64_v41, %v64_v41  ;;  %v907_v44 = vld [vmem:[#allocation5 + $0x128] ss:$16 sps:$4 sm:$0xff]   ;;  %v910_v46 = vld [vmem:[#allocation5 + $0x14c] ss:$16 sps:$4 sm:$0xff]   ;;  %v902_v47 = vld [vmem:[#allocation5 + $0x184] ss:$16 sps:$4 sm:$0xff]   ;;  %v722_v1 = vcombine.low %v64_v41, %v64_v41  ;;  %v131_v12 = vlaneseq }
  0x48   :  { %527 = vmatprep.subr.bf16.mxu1 %v874_v19  ;;  %v913_v48 = vld [vmem:[#allocation5 + $0x148] ss:$16 sps:$4 sm:$0xff]   ;;  %v916_v49 = vld [vmem:[#allocation5 + $0x16c] ss:$16 sps:$4 sm:$0xff]   ;;  %v906_v50 = vld [vmem:[#allocation5 + $0x180] ss:$16 sps:$4 sm:$0xff]  }
  0x49   :  { %510 = vmatprep.mubr.bf16.mxu0 %v723_v43  ;;  %551 = vmatprep.mubr.bf16.mxu1 %v723_v43  ;;  %v908_v51 = vld [vmem:[#allocation5 + $0x1a4] ss:$16 sps:$4 sm:$0xff]   ;;  %v919_v52 = vld [vmem:[#allocation5 + $0x168] ss:$16 sps:$4 sm:$0xff]   ;;  %v922_v53 = vld [vmem:[#allocation5 + $0x18c] ss:$16 sps:$4 sm:$0xff]  }
  0x4a   :  { %487 = vmatpush1.bf16.msra.mxu0 %v858_v16  ;;  %v912_v54 = vld [vmem:[#allocation5 + $0x1a0] ss:$16 sps:$4 sm:$0xff]   ;;  %v914_v55 = vld [vmem:[#allocation5 + $0x1c4] ss:$16 sps:$4 sm:$0xff]   ;;  %v925_v56 = vld [vmem:[#allocation5 + $0x188] ss:$16 sps:$4 sm:$0xff]  }
  0x4b   :  { %488 = vmatprep.subr.bf16.mxu0 %v860_v17  ;;  %528 = vmatpush1.bf16.msra.mxu1 %v877_v22  ;;  %v928_v57 = vld [vmem:[#allocation5 + $0x1ac] ss:$16 sps:$4 sm:$0xff]   ;;  %v918_v58 = vld [vmem:[#allocation5 + $0x1c0] ss:$16 sps:$4 sm:$0xff]   ;;  %v920_v59 = vld [vmem:[#allocation5 + $0x1e4] ss:$16 sps:$4 sm:$0xff]  }
  0x4c   :  { %529 = vmatprep.subr.bf16.mxu1 %v880_v23  ;;  %v930_v60 = vld [vmem:[#allocation5 + $0x1a8] ss:$16 sps:$4 sm:$0xff]   ;;  %v931_v61 = vld [vmem:[#allocation5 + $0x1cc] ss:$16 sps:$4 sm:$0xff]   ;;  %v924_v62 = vld [vmem:[#allocation5 + $0x1e0] ss:$16 sps:$4 sm:$0xff]  }
  0x4d   :  { %v933_v63 = vld [vmem:[#allocation5 + $0x1c8] ss:$16 sps:$4 sm:$0xff]   ;;  %v934_v0 = vld [vmem:[#allocation5 + $0x1ec] ss:$16 sps:$4 sm:$0xff]   ;;  %v937_v3 = vld [vmem:[#allocation7] sm:$0xff]   ;;  %vm1087_vm0 = vmmov 0  }
  0x4e   :  { %489 = vmatpush1.bf16.msra.mxu0 %v864_v20  ;;  %v936_v2 = vld [vmem:[#allocation5 + $0x1e8] ss:$16 sps:$4 sm:$0xff]   ;;  %v939_v6 = vld [vmem:[#allocation7 + $0x10] sm:$0xff]   ;;  %v941_v8 = vld [vmem:[#allocation7 + $0x20] sm:$0xff]   ;;  %v132_v13 = vshrl.u32 %v131_v12, 7 }
  0x4f   :  { %490 = vmatprep.subr.bf16.mxu0 %v866_v21  ;;  %530 = vmatpush1.bf16.msra.mxu1 %v883_v26  ;;  %v938_v5 = vld [vmem:[#allocation7 + $0x8] sm:$0xff]   ;;  %v940_v7 = vld [vmem:[#allocation7 + $0x18] sm:$0xff]   ;;  %v943_v10 = vld [vmem:[#allocation7 + $0x30] sm:$0xff]  }
  0x50   :  { %531 = vmatprep.subr.bf16.mxu1 %v886_v27  ;;  %v942_v9 = vld [vmem:[#allocation7 + $0x28] sm:$0xff]   ;;  %v944_v11 = vld [vmem:[#allocation7 + $0x38] sm:$0xff]   ;;  %v133_v14 = vsub.s32 0, %v132_v13  ;;  %v137_v16 = vsub.s32 1, %v132_v13  ;;  %v145_v19 = vsub.s32 3, %v132_v13 }
  0x51   :  { %v129_v15 = vld [vmem:[%s1195_s4] sm:$0xf]  ;;  %s1088_s4 = smov [#allocation9]  }
  0x52   :  { %491 = vmatpush1.bf16.msra.mxu0 %v870_v24  ;;  %v134_v17 = vrot.slane %v129_v15, %v133_v14  ;;  %v138_v18 = vrot.slane %v129_v15, %v137_v16  ;;  %v146_v27 = vrot.slane %v129_v15, %v145_v19  ;;  %s708_s13 = sshll.u32 %s1088_s4, 4  ;;  %s709_s13 = int_to_ptr.vmem [resolvable:$true] %s708_s13 }
  0x53   :  { %492 = vmatprep.subr.bf16.mxu0 %v872_v25  ;;  %532 = vmatpush1.bf16.msra.mxu1 %v889_v30  ;;  %s1027_s14 = scalar_lea.vmem %s709_s13, 128  ;;  %p1032_p11 = scmp.lt.s32.totalorder %s709_s13, %s709_s13 }
  0x54   :  { %533 = vmatprep.subr.bf16.mxu1 %v892_v31  ;;  %p1028_p10 = scmp.ne.s32.totalorder %s709_s13, %s1027_s14  ;;  %p1033_p12 = scmp.lt.s32.totalorder %s1027_s14, %s1027_s14 }
  0x56   :  { %493 = vmatpush1.bf16.msra.mxu0 %v876_v28  ;;  %p1034_p13 = por %p1033_p12, %p1032_p11 }
  0x57   :  { %494 = vmatprep.subr.bf16.mxu0 %v878_v29  ;;  %534 = vmatpush1.bf16.msra.mxu1 %v895_v34  ;;  %v141_v29 = vsub.s32 2, %v132_v13 }
  0x58   :  { %535 = vmatprep.subr.bf16.mxu1 %v898_v35  ;;  %p1035_p0 = pnand %p1034_p13, %p1028_p10 }
  0x59   :  { %v142_v34 = vrot.slane %v129_v15, %v141_v29 }
  0x5a   :  { %495 = vmatpush1.bf16.msra.mxu0 %v882_v32 }
  0x5b   :  { %496 = vmatprep.subr.bf16.mxu0 %v884_v33  ;;  %536 = vmatpush1.bf16.msra.mxu1 %v901_v38 }
  0x5c   :  { %537 = vmatprep.subr.bf16.mxu1 %v904_v39 }
  0x5e   :  { %497 = vmatpush1.bf16.msra.mxu0 %v888_v36 }
  0x5f   :  { %498 = vmatprep.subr.bf16.mxu0 %v890_v37  ;;  %538 = vmatpush1.bf16.msra.mxu1 %v907_v44  ;;  %v579_v44 = vld [vmem:[#allocation2] sm:$0xff] }
  0x60   :  { %539 = vmatprep.subr.bf16.mxu1 %v910_v46 }
  0x62   :  { %499 = vmatpush1.bf16.msra.mxu0 %v894_v40 }
  0x63   :  { %500 = vmatprep.subr.bf16.mxu0 %v896_v42  ;;  %540 = vmatpush1.bf16.msra.mxu1 %v913_v48 }
  0x64   :  { %541 = vmatprep.subr.bf16.mxu1 %v916_v49 }
  0x66   :  { %501 = vmatpush1.bf16.msra.mxu0 %v900_v45 }
  0x67   :  { %502 = vmatprep.subr.bf16.mxu0 %v902_v47  ;;  %542 = vmatpush1.bf16.msra.mxu1 %v919_v52 }
  0x68   :  { %543 = vmatprep.subr.bf16.mxu1 %v922_v53 }
  0x6a   :  { %503 = vmatpush1.bf16.msra.mxu0 %v906_v50 }
  0x6b   :  { %504 = vmatprep.subr.bf16.mxu0 %v908_v51  ;;  %544 = vmatpush1.bf16.msra.mxu1 %v925_v56 }
  0x6c   :  { %545 = vmatprep.subr.bf16.mxu1 %v928_v57 }
  0x6e   :  { %505 = vmatpush1.bf16.msra.mxu0 %v912_v54 }
  0x6f   :  { %506 = vmatprep.subr.bf16.mxu0 %v914_v55  ;;  %546 = vmatpush1.bf16.msra.mxu1 %v930_v60 }
  0x70   :  { %547 = vmatprep.subr.bf16.mxu1 %v931_v61 }
  0x72   :  { %507 = vmatpush1.bf16.msra.mxu0 %v918_v58 }
  0x73   :  { %508 = vmatprep.subr.bf16.mxu0 %v920_v59  ;;  %548 = vmatpush1.bf16.msra.mxu1 %v933_v63 }
  0x74   :  { %549 = vmatprep.subr.bf16.mxu1 %v934_v0 }
  0x76   :  { %509 = vmatpush1.bf16.msra.mxu0 %v924_v62 }
  0x77   :  { %550 = vmatpush1.bf16.msra.mxu1 %v936_v2  ;;  %808 = vmatprep.subr.bf16.mxu0 %v1086_v4 }
  0x79   :  { %511 = vmatmul.mubr.bf16.vlgmr.msra.gmra.mrb[0].mxu0 %v722_v1 }
  0x7a   :  { %552 = vmatmul.mubr.bf16.vlgmr.msra.gmra.mrb[0].mxu1 %v722_v1  ;;  %809 = vmatpush3.bf16.msra.mxu0 %v937_v3 }
  0x7b   :  { %810 = vmatprep.subr.bf16.mxu0 %v1086_v4  ;;  %824 = vmatprep.mubr.msk.bf16.mxu0 %vm1087_vm0, %v1086_v4 }
  0x7e   :  { %811 = vmatpush3.bf16.msra.mxu0 %v938_v5 }
  0x7f   :  { %812 = vmatprep.subr.bf16.mxu0 %v1086_v4 }
  0x82   :  { %813 = vmatpush3.bf16.msra.mxu0 %v939_v6 }
  0x83   :  { %814 = vmatprep.subr.bf16.mxu0 %v1086_v4 }
  0x86   :  { %815 = vmatpush3.bf16.msra.mxu0 %v940_v7 }
  0x87   :  { %816 = vmatprep.subr.bf16.mxu0 %v1086_v4 }
  0x8a   :  { %817 = vmatpush3.bf16.msra.mxu0 %v941_v8 }
  0x8b   :  { %818 = vmatprep.subr.bf16.mxu0 %v1086_v4 }
  0x8e   :  { %819 = vmatpush3.bf16.msra.mxu0 %v942_v9 }
  0x8f   :  { %820 = vmatprep.subr.bf16.mxu0 %v1086_v4 }
  0x92   :  { %821 = vmatpush3.bf16.msra.mxu0 %v943_v10 }
  0x93   :  { %822 = vmatprep.subr.bf16.mxu0 %v1086_v4 }
  0x96   :  { %823 = vmatpush3.bf16.msra.mxu0 %v944_v11 }
 0x14c   :  { %v512_v20 = vpop.f32.mrb[0].mxu0 }
 0x14d   :  { %v513_v21 = vadd.f32 %v512_v20, %v134_v17  ;;  %v514_v22 = vpop.f32.mrb[1].mxu0  ;;  %v553_v30 = vpop.f32.mrb[0].mxu1 }
 0x14e   :  { %v515_v23 = vadd.f32 %v514_v22, %v138_v18  ;;  %v516_v24 = vpop.f32.mrb[2].mxu0  ;;  %v555_v31 = vpop.f32.mrb[1].mxu1  ;;  %v554_v37 = vadd.f32 %v553_v30, %v142_v34 }
 0x14f   :  { %v788_v25 = vmul.f32 -1.442695, %v513_v21  ;;  %v517_v26 = vpop.f32.mrb[3].mxu0  ;;  %v556_v32 = vadd.f32 %v555_v31, %v146_v27  ;;  %v557_v33 = vpop.f32.mrb[2].mxu1 }
 0x150   :  { %v789_v28 = vmul.f32 -1.442695, %v515_v23  ;;  %v558_v35 = vpop.f32.mrb[3].mxu1 }
 0x151   :  { %945 = vpow2.f32 %v788_v25  ;;  %v790_v36 = vmul.f32 -1.442695, %v556_v32 }
 0x152   :  { %947 = vpow2.f32 %v789_v28 }
 0x153   :  { %949 = vpow2.f32 %v790_v36 }
 0x154   :  { %951 = vtanh.f32 %v554_v37 }
 0x15b   :  { %v946_v38 = vpop.eup %945 }
 0x15c   :  { %v948_v39 = vpop.eup %947  ;;  %v563_v40 = vadd.f32 1.0, %v946_v38 }
 0x15d   :  { %v569_v41 = vadd.f32 1.0, %v948_v39  ;;  %v950_v42 = vpop.eup %949 }
 0x15e   :  { %953 = vrcp.f32 %v563_v40  ;;  %v952_v43 = vpop.eup %951  ;;  %v576_v46 = vadd.f32 1.0, %v950_v42 }
 0x15f   :  { %955 = vrcp.f32 %v569_v41 }
 0x160   :  { %957 = vrcp.f32 %v576_v46 }
 0x168   :  { %v954_v45 = vpop.eup %953 }
 0x169   :  { %v956_v47 = vpop.eup %955  ;;  %v581_v48 = vmul.f32 %v954_v45, %v952_v43 }
 0x16a   :  { %v580_v49 = vmul.f32 %v956_v47, %v579_v44  ;;  %v958_v51 = vpop.eup %957 }
 0x16c   :  { %v582_v50 = vadd.f32 %v581_v48, %v580_v49 }
 0x16e   :  { %959 = vtanh.f32 %v582_v50  ;;  %690 = vst [vmem:[#allocation9] sm:$0xff] %v582_v50 }
 0x178   :  { %v960_v52 = vpop.eup %959 }
 0x179   :  { %v584_v53 = vmul.f32 %v960_v52, %v958_v51 }
 0x17b   :  { %v585_v54 = vpack.c.bf16 %v584_v53, %v584_v53 }
 0x17d   :  { %825 = vmatmul.mubr.bf16.vlgmr.msra.gmra.mrb[4].mxu0 %v585_v54 }
 0x17e   :  { %1038 = shalt.err (!%p1035_p0)
}
 0x17f   :  { %s1039_s17 = scalar_lea.hbm %s1197_s6, 128 }
 0x180   :  { %p1040_p1 = scmp.ne.s32.totalorder %s1197_s6, %s1039_s17  ;;  %p1043_p2 = scmp.lt.u32.totalorder %s1039_s17, %s1197_s6 }
 0x182   :  { %p1045_p3 = pnand %p1043_p2, %p1040_p1 }
 0x184   :  { %1048 = shalt.err (!%p1045_p3)
}
 0x185   :  { %711 = dma.vmem_to_hbm [thread:$0]  %s709_s13, 128, %s1197_s6, [#allocation10]  }
 0x186   :  { %s1089_s23 = smov [#allocation8]  }
 0x187   :  { %s698_s24 = sshll.u32 %s1089_s23, 4  ;;  %s699_s24 = int_to_ptr.vmem [resolvable:$true] %s698_s24 }
 0x188   :  { %s1049_s25 = scalar_lea.vmem %s699_s24, 128  ;;  %p1054_p5 = scmp.lt.s32.totalorder %s699_s24, %s699_s24 }
 0x189   :  { %p1050_p4 = scmp.ne.s32.totalorder %s699_s24, %s1049_s25  ;;  %p1055_p6 = scmp.lt.s32.totalorder %s1049_s25, %s1049_s25 }
 0x18b   :  { %p1056_p7 = por %p1055_p6, %p1054_p5 }
 0x18d   :  { %p1057_p8 = pnand %p1056_p7, %p1050_p4 }
 0x250   :  { %v684_v55 = vpop.f32.mrb[4].mxu0 }
 0x251   :  { %691 = vst [vmem:[#allocation8] sm:$0xff] %v684_v55  ;;  %v826_v56 = vpop.f32.mrb[5].mxu0 }
 0x252   :  { %v687_v57 = vpop.f32.mrb[6].mxu0 }
 0x253   :  { %1060 = shalt.err (!%p1057_p8)
}
 0x254   :  { %s1061_s28 = scalar_lea.hbm %s1196_s5, 128 }
 0x255   :  { %p1062_p9 = scmp.ne.s32.totalorder %s1196_s5, %s1061_s28  ;;  %p1065_p10 = scmp.lt.u32.totalorder %s1061_s28, %s1196_s5 }
 0x257   :  { %p1067_p11 = pnand %p1065_p10, %p1062_p9 }
 0x259   :  { %1070 = shalt.err (!%p1067_p11)
}
 0x25a   :  { %701 = dma.vmem_to_hbm [thread:$0]  %s699_s24, 128, %s1196_s5, [#allocation4]   ;;  %v827_v58 = vpop.f32.mrb[7].mxu0 }
 0x25b   :  { %1075 = dma.done.wait [#allocation4], 128  }
 0x25c   :  { %1076 = vsyncadd [#allocation4], 4294967168 }
 0x25d   :  { %1077 = dma.done.wait [#allocation10], 128  }
 0x25e   :  { %1078 = vsyncadd [#allocation10], 4294967168 }
 0x25f   :  { %718 = vsyncpa [#allocation3], 1 }
 0x260   :  { %719 = vsyncpa [#allocation6], 1 }
 0x261   :  { %720 = vsyncpa [#allocation4], 1 }
 0x262   :  { %721 = vsyncpa [#allocation10], 1 }

</bundles_post_ra>
